<compile_context>
chip_gen: v5e
topology: v5e:2x2
jax: 0.10.0
libtpu: 0.0.40
codegen_flags: <defaults>
</compile_context>

<pallas_src>
import functools

import jax
import jax.numpy as jnp
from jax.experimental import pallas as pl
from jax.experimental.pallas import tpu as pltpu

HIDDEN = 20
INCHANNELS = 15
FC_CHANNELS = 15
OUTCHANNELS = 3
NUMNODESPERGRAPH = 201
BN_EPS = 1e-5
LEAKY_SLOPE = 0.01

# ---- packed-parameter slab layout (row offsets; starts 8-aligned) ------------------
# Weight slab WS: (WS_ROWS, WS_COLS) f32, weights stored channel-major (out, in).
WS_COLS = 32
R_W0, R_W1, R_WL, R_WA, R_WR = 0, 24, 48, 64, 72
WS_ROWS = 80
# Vector slab VS: (VS_ROWS, 1) f32, per-channel vectors stored as columns at lane 0.
V_S0, V_T0, V_B0 = 0, 16, 32
V_S1, V_T1, V_B1 = 56, 80, 104
V_SL, V_TL, V_BL = 128, 152, 176
V_PE, V_BA, V_BR = 192, 216, 224
VS_ROWS = 232

_VMEM = pl.BlockSpec(memory_space=pltpu.MemorySpace.VMEM)


# -----------------------------------------------------------------------------------
# Fused Pallas kernel (channel-major: activations are (C, n_pad))
# -----------------------------------------------------------------------------------
def _fused_forward_kernel(x_ref, ws_ref, vs_ref, o_ref, *, num_graphs):
    """x_ref : (INCHANNELS, n_pad): lanes [0,G) = per-graph middle nodes,
               lanes [G,2G) = promoter rows, remaining lanes zero padding.
       ws_ref: packed weight slab.  vs_ref: packed scale/shift/bias slab.
       o_ref : (OUTCHANNELS, n_pad): lanes [0,G) hold the per-graph outputs."""
    f32 = jnp.float32
    G = num_graphs
    n_pad = x_ref.shape[1]

    # ---- packed parameter views (static Ref slices, no extra DMAs) ----
    w0 = ws_ref[R_W0:R_W0 + HIDDEN, :INCHANNELS]           # (H, Cin)
    w1 = ws_ref[R_W1:R_W1 + HIDDEN, :HIDDEN]               # (H, H)
    wL = ws_ref[R_WL:R_WL + FC_CHANNELS, :HIDDEN]          # (F, H)
    wa = ws_ref[R_WA:R_WA + 2, :FC_CHANNELS]               # (2, F): [att_w_prom; att_w_x]
    wr = ws_ref[R_WR:R_WR + OUTCHANNELS, :FC_CHANNELS]     # (out, F)

    s0 = vs_ref[V_S0:V_S0 + INCHANNELS]; t0 = vs_ref[V_T0:V_T0 + INCHANNELS]
    b0 = vs_ref[V_B0:V_B0 + HIDDEN]
    s1 = vs_ref[V_S1:V_S1 + HIDDEN];     t1 = vs_ref[V_T1:V_T1 + HIDDEN]
    b1 = vs_ref[V_B1:V_B1 + HIDDEN]
    sL = vs_ref[V_SL:V_SL + HIDDEN];     tL = vs_ref[V_TL:V_TL + HIDDEN]
    bL = vs_ref[V_BL:V_BL + FC_CHANNELS]
    pe = vs_ref[V_PE:V_PE + HIDDEN]                         # pe[numnodes // 2]
    ba = vs_ref[V_BA:V_BA + 1]                              # (1, 1)
    br = vs_ref[V_BR:V_BR + OUTCHANNELS]                    # (out, 1)

    x = x_ref[...]                                          # (Cin, Np)
    x = jnp.where(x != x, 0.0, x)                           # NaN scrub (isnan == x != x)

    # embedding[0]: Linear(ReLU(BN(x)))   (BN pre-folded into scale/shift)
    a = jnp.maximum(x * s0 + t0, 0.0)
    h0 = jnp.dot(w0, a, preferred_element_type=f32) + b0                 # (H, Np)
    # embedding[1] with residual:  x <- x + Linear(ReLU(BN(x)))
    a = jnp.maximum(h0 * s1 + t1, 0.0)
    h1 = h0 + jnp.dot(w1, a, preferred_element_type=f32) + b1            # (H, Np)

    # positional encoding: only the graph-path (middle-node) columns receive it.
    lane = jax.lax.broadcasted_iota(jnp.int32, (1, n_pad), 1)
    h1 = h1 + pe * (lane < G).astype(f32)

    # TODO(synk): Deep_GATE_Conv graph convolutions (class definition not provided)
    # — treated as identity on node features here.  If a real cross-node convolution
    # is added, go back to processing the full node slab (see header note).

    # fc ("lin") layer: Linear(ReLU(BN(x)))
    a = jnp.maximum(h1 * sL + tL, 0.0)
    xfc = jnp.dot(wL, a, preferred_element_type=f32) + bL                # (F, Np)

    # ---- gating + readout head ----
    lr = jnp.where(xfc > 0, xfc, LEAKY_SLOPE * xfc)                      # leaky_relu
    z = jnp.dot(wa, lr, preferred_element_type=f32)                      # (2, Np) partial logits
    y = jnp.dot(wr, xfc, preferred_element_type=f32) + br                # (out, Np) readout of every column

    # Align promoter columns (lanes [G,2G)) with their graph columns (lanes [0,G))
    # via a cyclic lane-roll by -G (== +n_pad-G); XLU op, off the MXU critical path.
    shift = n_pad - G
    logit = pltpu.roll(z[0:1], shift, axis=1) + z[1:2] + ba              # (1, Np)
    lw = jax.nn.sigmoid(logit)
    y_prom = pltpu.roll(y, shift, axis=1)
    # readout is affine and the blend weights sum to 1, so blending the readouts
    # equals the readout of the blend:  lw*read(prom) + (1-lw)*read(mid).
    o_ref[...] = lw * y_prom + (1.0 - lw) * y                            # (out, Np)


# -----------------------------------------------------------------------------------
# One-time parameter preparation (hoisted out of the hot path; call once, reuse)
# -----------------------------------------------------------------------------------
def prepare_params(params, *, numnodes=NUMNODESPERGRAPH):
    """Fold BN running stats, transpose weights to channel-major and pack everything
    into two small VMEM slabs.  The steady-state forward has no parameter-only ops."""
    def fold(bn):
        scale = bn["gamma"] * jax.lax.rsqrt(bn["var"] + BN_EPS)
        shift = bn["beta"] - bn["mean"] * scale
        return scale.reshape(-1), shift.reshape(-1)

    s0, t0 = fold(params["emb0_bn"])
    s1, t1 = fold(params["emb1_bn"])
    sL, tL = fold(params["lin_bn"])

    ws = jnp.zeros((WS_ROWS, WS_COLS), jnp.float32)
    ws = ws.at[R_W0:R_W0 + HIDDEN, :INCHANNELS].set(params["emb0_w"].T)
    ws = ws.at[R_W1:R_W1 + HIDDEN, :HIDDEN].set(params["emb1_w"].T)
    ws = ws.at[R_WL:R_WL + FC_CHANNELS, :HIDDEN].set(params["lin_w"].T)
    w_att2 = jnp.stack([params["att_w_prom"].reshape(-1),
                        params["att_w_x"].reshape(-1)], axis=0)          # (2, F)
    ws = ws.at[R_WA:R_WA + 2, :FC_CHANNELS].set(w_att2)
    ws = ws.at[R_WR:R_WR + OUTCHANNELS, :FC_CHANNELS].set(params["read_w"].T)

    vs = jnp.zeros((VS_ROWS, 1), jnp.float32)

    def put(vslab, off, vec):
        vec = jnp.asarray(vec, jnp.float32).reshape(-1)
        return vslab.at[off:off + vec.shape[0], 0].set(vec)

    vs = put(vs, V_S0, s0); vs = put(vs, V_T0, t0); vs = put(vs, V_B0, params["emb0_b"])
    vs = put(vs, V_S1, s1); vs = put(vs, V_T1, t1); vs = put(vs, V_B1, params["emb1_b"])
    vs = put(vs, V_SL, sL); vs = put(vs, V_TL, tL); vs = put(vs, V_BL, params["lin_b"])
    vs = put(vs, V_PE, params["pe"][numnodes // 2])      # PE of the middle-node position
    vs = put(vs, V_BA, params["att_b"])
    vs = put(vs, V_BR, params["read_b"])

    return dict(ws=jax.device_put(ws), vs=jax.device_put(vs))


# -----------------------------------------------------------------------------------
# Steady-state forward: column packing + ONE pallas_call + output slice
# -----------------------------------------------------------------------------------
@functools.partial(jax.jit, static_argnames=("num_graphs", "numnodes"))
def gate_promoter_forward(prepared, node_x, prom_x, *, num_graphs,
                          numnodes=NUMNODESPERGRAPH):
    G = num_graphs
    n_valid = 2 * G
    n_pad = max(128, ((n_valid + 127) // 128) * 128)     # lane-dense column count

    # While Deep_GATE_Conv is identity, only the per-graph middle node and promoter
    # rows influence the output -> pack exactly those 2*G columns, channel-major.
    mid = node_x[numnodes // 2::numnodes].astype(jnp.float32)            # (G, Cin)
    prom = prom_x.reshape(-1, INCHANNELS).astype(jnp.float32)            # (G, Cin)
    cols = jnp.concatenate([mid, prom], axis=0).T                        # (Cin, 2G)
    x_t = jnp.pad(cols, ((0, 0), (0, n_pad - n_valid)))                  # (Cin, n_pad)

    flops = 2 * n_pad * (INCHANNELS * HIDDEN + HIDDEN * HIDDEN
                         + HIDDEN * FC_CHANNELS + 2 * FC_CHANNELS
                         + FC_CHANNELS * OUTCHANNELS)
    bytes_accessed = 4 * (x_t.size + WS_ROWS * WS_COLS + VS_ROWS
                          + OUTCHANNELS * n_pad)

    kern = functools.partial(_fused_forward_kernel, num_graphs=G)
    out = pl.pallas_call(
        kern,
        out_shape=jax.ShapeDtypeStruct((OUTCHANNELS, n_pad), jnp.float32),
        in_specs=[_VMEM, _VMEM, _VMEM],
        out_specs=_VMEM,
        cost_estimate=pl.CostEstimate(flops=flops, transcendentals=n_pad,
                                      bytes_accessed=bytes_accessed),
    )(x_t, prepared["ws"], prepared["vs"])
    return out[:, :G].T                                                  # (G, out)


# -----------------------------------------------------------------------------------
# Parameter init (deterministic, PyTorch-default-like)
# -----------------------------------------------------------------------------------
def _linear_init(key, fan_in, fan_out):
    kw, kb = jax.random.split(key)
    bound = 1.0 / jnp.sqrt(float(fan_in))
    w = jax.random.uniform(kw, (fan_in, fan_out), jnp.float32, -bound, bound)
    b = jax.random.uniform(kb, (1, fan_out), jnp.float32, -bound, bound)
    return w, b


def _bn_init(c):
    return dict(gamma=jnp.ones((1, c), jnp.float32),
                beta=jnp.zeros((1, c), jnp.float32),
                mean=jnp.zeros((1, c), jnp.float32),
                var=jnp.ones((1, c), jnp.float32))


def _sinusoidal_pe(length, d):
    # standard sinusoidal positional encoding (PositionalEncoding class body not given)
    pos = jnp.arange(length, dtype=jnp.float32)[:, None]
    div = jnp.exp(jnp.arange(0, d, 2, dtype=jnp.float32) * (-jnp.log(10000.0) / d))
    ang = pos * div
    pe = jnp.zeros((length, d), jnp.float32)
    pe = pe.at[:, 0::2].set(jnp.sin(ang))
    pe = pe.at[:, 1::2].set(jnp.cos(ang))
    return pe


def init_params(key):
    ks = jax.random.split(key, 8)
    emb0_w, emb0_b = _linear_init(ks[0], INCHANNELS, HIDDEN)
    emb1_w, emb1_b = _linear_init(ks[1], HIDDEN, HIDDEN)
    lin_w, lin_b = _linear_init(ks[2], HIDDEN, FC_CHANNELS)
    read_w, read_b = _linear_init(ks[3], FC_CHANNELS, OUTCHANNELS)
    att_w, att_b = _linear_init(ks[4], 2 * FC_CHANNELS, 1)
    return dict(
        emb0_bn=_bn_init(INCHANNELS), emb0_w=emb0_w, emb0_b=emb0_b,
        emb1_bn=_bn_init(HIDDEN), emb1_w=emb1_w, emb1_b=emb1_b,
        lin_bn=_bn_init(HIDDEN), lin_w=lin_w, lin_b=lin_b,
        read_w=read_w, read_b=read_b,
        att_w_prom=att_w[:FC_CHANNELS, :],   # first half multiplies prom_x
        att_w_x=att_w[FC_CHANNELS:, :],      # second half multiplies x_mid
        att_b=att_b,
        pe=_sinusoidal_pe(NUMNODESPERGRAPH, HIDDEN),
    )


# -----------------------------------------------------------------------------------
# Pure-JAX reference (full node path, row-major, mirrors the PyTorch forward)
# -----------------------------------------------------------------------------------
def _reference_forward(params, node_x, prom_x, *, num_graphs, numnodes):
    def bn_relu_lin(x, bn, w, b):
        inv = jax.lax.rsqrt(bn["var"] + BN_EPS)
        h = (x - bn["mean"]) * inv * bn["gamma"] + bn["beta"]
        h = jnp.maximum(h, 0.0)
        return jnp.dot(h, w, precision="highest") + b

    def module(x, propagate):
        x = jnp.where(jnp.isnan(x), 0.0, x)
        x = bn_relu_lin(x, params["emb0_bn"], params["emb0_w"], params["emb0_b"])
        x = x + bn_relu_lin(x, params["emb1_bn"], params["emb1_w"], params["emb1_b"])
        if propagate:
            d = x.shape[1]
            x = (x.reshape(num_graphs, numnodes, d)
                 + params["pe"][:numnodes]).reshape(-1, d)
        # Deep_GATE_Conv treated as identity (definition not provided)
        return bn_relu_lin(x, params["lin_bn"], params["lin_w"], params["lin_b"])

    xg = module(node_x.astype(jnp.float32), True)
    xp = module(prom_x.reshape(-1, INCHANNELS).astype(jnp.float32), False)
    x_mid = xg.reshape(num_graphs, numnodes, -1)[:, numnodes // 2, :]
    att_in = jnp.concatenate([xp, x_mid], axis=1)
    att_in = jnp.where(att_in > 0, att_in, LEAKY_SLOPE * att_in)
    att_w = jnp.concatenate([params["att_w_prom"], params["att_w_x"]], axis=0)
    lw = jax.nn.sigmoid(jnp.dot(att_in, att_w, precision="highest") + params["att_b"])
    x = lw * xp + (1.0 - lw) * x_mid
    return jnp.dot(x, params["read_w"], precision="highest") + params["read_b"]


if __name__ == "__main__":
    key = jax.random.PRNGKey(0)
    k_node, k_prom = jax.random.split(key)

    num_graphs = 2
    numnodes = NUMNODESPERGRAPH  # 201 nodes per graph (module default)

    node_x = jax.random.normal(k_node, (num_graphs * numnodes, INCHANNELS),
                               dtype=jnp.float32)
    prom_x = jax.random.normal(k_prom, (num_graphs, INCHANNELS), dtype=jnp.float32)
    # exercise the NaN scrub on both paths (module zeroes NaNs before the embeddings)
    node_x = node_x.at[numnodes // 2, 3].set(jnp.nan)
    prom_x = prom_x.at[1, 0].set(jnp.nan)

    params = init_params(jax.random.PRNGKey(12345))
    prepared = prepare_params(params, numnodes=numnodes)   # one-time, out of hot path

    out = gate_promoter_forward(prepared, node_x, prom_x,
                                num_graphs=num_graphs, numnodes=numnodes)
    out = jax.block_until_ready(out)
    assert out.shape == (num_graphs, OUTCHANNELS)
    assert out.dtype == jnp.float32

    ref = _reference_forward(params, node_x, prom_x,
                             num_graphs=num_graphs, numnodes=numnodes)
    assert jnp.allclose(out, ref, rtol=1e-2, atol=1e-2), "kernel/reference mismatch"

    print("KERNEL_OK")
</pallas_src>

<mosaic_0001>
module attributes {stable_mosaic.version = 11 : i64} {
  func.func @_fused_forward_kernel(%arg0: memref<15x128xf32, #tpu.memory_space<vmem>>, %arg1: memref<80x32xf32, #tpu.memory_space<vmem>>, %arg2: memref<232x1xf32, #tpu.memory_space<vmem>>, %arg3: memref<3x128xf32, #tpu.memory_space<vmem>>) attributes {dimension_semantics = [], scalar_prefetch = 0 : i64, scratch_operands = 0 : i64, tpu.core_type = #tpu.core_type<tc>} {
    %c0 = arith.constant 0 : index
    %c0_0 = arith.constant 0 : index
    %0 = vector.load %arg1[%c0, %c0_0] : memref<80x32xf32, #tpu.memory_space<vmem>>, vector<20x15xf32>
    %c24 = arith.constant 24 : index
    %c0_1 = arith.constant 0 : index
    %1 = vector.load %arg1[%c24, %c0_1] : memref<80x32xf32, #tpu.memory_space<vmem>>, vector<20x20xf32>
    %c48 = arith.constant 48 : index
    %c0_2 = arith.constant 0 : index
    %2 = vector.load %arg1[%c48, %c0_2] : memref<80x32xf32, #tpu.memory_space<vmem>>, vector<15x20xf32>
    %c64 = arith.constant 64 : index
    %c0_3 = arith.constant 0 : index
    %3 = vector.load %arg1[%c64, %c0_3] : memref<80x32xf32, #tpu.memory_space<vmem>>, vector<2x15xf32>
    %c72 = arith.constant 72 : index
    %c0_4 = arith.constant 0 : index
    %4 = vector.load %arg1[%c72, %c0_4] : memref<80x32xf32, #tpu.memory_space<vmem>>, vector<3x15xf32>
    %c0_5 = arith.constant 0 : index
    %c0_6 = arith.constant 0 : index
    %5 = vector.load %arg2[%c0_5, %c0_6] : memref<232x1xf32, #tpu.memory_space<vmem>>, vector<15x1xf32>
    %c16 = arith.constant 16 : index
    %c0_7 = arith.constant 0 : index
    %6 = vector.load %arg2[%c16, %c0_7] : memref<232x1xf32, #tpu.memory_space<vmem>>, vector<15x1xf32>
    %c32 = arith.constant 32 : index
    %c0_8 = arith.constant 0 : index
    %7 = vector.load %arg2[%c32, %c0_8] : memref<232x1xf32, #tpu.memory_space<vmem>>, vector<20x1xf32>
    %c56 = arith.constant 56 : index
    %c0_9 = arith.constant 0 : index
    %8 = vector.load %arg2[%c56, %c0_9] : memref<232x1xf32, #tpu.memory_space<vmem>>, vector<20x1xf32>
    %c80 = arith.constant 80 : index
    %c0_10 = arith.constant 0 : index
    %9 = vector.load %arg2[%c80, %c0_10] : memref<232x1xf32, #tpu.memory_space<vmem>>, vector<20x1xf32>
    %c104 = arith.constant 104 : index
    %c0_11 = arith.constant 0 : index
    %10 = vector.load %arg2[%c104, %c0_11] : memref<232x1xf32, #tpu.memory_space<vmem>>, vector<20x1xf32>
    %c128 = arith.constant 128 : index
    %c0_12 = arith.constant 0 : index
    %11 = vector.load %arg2[%c128, %c0_12] : memref<232x1xf32, #tpu.memory_space<vmem>>, vector<20x1xf32>
    %c152 = arith.constant 152 : index
    %c0_13 = arith.constant 0 : index
    %12 = vector.load %arg2[%c152, %c0_13] : memref<232x1xf32, #tpu.memory_space<vmem>>, vector<20x1xf32>
    %c176 = arith.constant 176 : index
    %c0_14 = arith.constant 0 : index
    %13 = vector.load %arg2[%c176, %c0_14] : memref<232x1xf32, #tpu.memory_space<vmem>>, vector<15x1xf32>
    %c192 = arith.constant 192 : index
    %c0_15 = arith.constant 0 : index
    %14 = vector.load %arg2[%c192, %c0_15] : memref<232x1xf32, #tpu.memory_space<vmem>>, vector<20x1xf32>
    %c216 = arith.constant 216 : index
    %c0_16 = arith.constant 0 : index
    %15 = vector.load %arg2[%c216, %c0_16] : memref<232x1xf32, #tpu.memory_space<vmem>>, vector<1x1xf32>
    %c224 = arith.constant 224 : index
    %c0_17 = arith.constant 0 : index
    %16 = vector.load %arg2[%c224, %c0_17] : memref<232x1xf32, #tpu.memory_space<vmem>>, vector<3x1xf32>
    %c0_18 = arith.constant 0 : index
    %c0_19 = arith.constant 0 : index
    %17 = vector.load %arg0[%c0_18, %c0_19] : memref<15x128xf32, #tpu.memory_space<vmem>>, vector<15x128xf32>
    %18 = arith.cmpf one, %17, %17 : vector<15x128xf32>
    %cst = arith.constant 0.000000e+00 : f32
    %19 = vector.broadcast %cst : f32 to vector<15x128xf32>
    %20 = arith.select %18, %19, %17 : vector<15x128xi1>, vector<15x128xf32>
    %21 = vector.broadcast %5 : vector<15x1xf32> to vector<15x128xf32>
    %22 = arith.mulf %20, %21 : vector<15x128xf32>
    %23 = vector.broadcast %6 : vector<15x1xf32> to vector<15x128xf32>
    %24 = arith.addf %22, %23 : vector<15x128xf32>
    %cst_20 = arith.constant 0.000000e+00 : f32
    %25 = vector.broadcast %cst_20 : f32 to vector<15x128xf32>
    %26 = arith.maximumf %24, %25 : vector<15x128xf32>
    %cst_21 = arith.constant dense<0.000000e+00> : vector<20x128xf32>
    %27 = tpu.matmul %0, %26, %cst_21 {dimension_numbers = #tpu.dot_dimension_numbers<[1], [0], [0], [1], [0, 0, 1, 1], [], []>} : vector<20x15xf32>, vector<15x128xf32>, vector<20x128xf32> -> vector<20x128xf32>
    %28 = vector.broadcast %7 : vector<20x1xf32> to vector<20x128xf32>
    %29 = arith.addf %27, %28 : vector<20x128xf32>
    %30 = vector.broadcast %8 : vector<20x1xf32> to vector<20x128xf32>
    %31 = arith.mulf %29, %30 : vector<20x128xf32>
    %32 = vector.broadcast %9 : vector<20x1xf32> to vector<20x128xf32>
    %33 = arith.addf %31, %32 : vector<20x128xf32>
    %cst_22 = arith.constant 0.000000e+00 : f32
    %34 = vector.broadcast %cst_22 : f32 to vector<20x128xf32>
    %35 = arith.maximumf %33, %34 : vector<20x128xf32>
    %cst_23 = arith.constant dense<0.000000e+00> : vector<20x128xf32>
    %36 = tpu.matmul %1, %35, %cst_23 {dimension_numbers = #tpu.dot_dimension_numbers<[1], [0], [0], [1], [0, 0, 1, 1], [], []>} : vector<20x20xf32>, vector<20x128xf32>, vector<20x128xf32> -> vector<20x128xf32>
    %37 = arith.addf %29, %36 : vector<20x128xf32>
    %38 = vector.broadcast %10 : vector<20x1xf32> to vector<20x128xf32>
    %39 = arith.addf %37, %38 : vector<20x128xf32>
    %40 = tpu.iota {dimensions = array<i32: 1>} : vector<1x128xi32>
    %c2_i32 = arith.constant 2 : i32
    %41 = vector.broadcast %c2_i32 : i32 to vector<1x128xi32>
    %42 = arith.cmpi slt, %40, %41 : vector<1x128xi32>
    %43 = arith.extui %42 : vector<1x128xi1> to vector<1x128xi32>
    %44 = arith.sitofp %43 : vector<1x128xi32> to vector<1x128xf32>
    %45 = vector.broadcast %14 : vector<20x1xf32> to vector<20x128xf32>
    %46 = vector.broadcast %44 : vector<1x128xf32> to vector<20x128xf32>
    %47 = arith.mulf %45, %46 : vector<20x128xf32>
    %48 = arith.addf %39, %47 : vector<20x128xf32>
    %49 = vector.broadcast %11 : vector<20x1xf32> to vector<20x128xf32>
    %50 = arith.mulf %48, %49 : vector<20x128xf32>
    %51 = vector.broadcast %12 : vector<20x1xf32> to vector<20x128xf32>
    %52 = arith.addf %50, %51 : vector<20x128xf32>
    %cst_24 = arith.constant 0.000000e+00 : f32
    %53 = vector.broadcast %cst_24 : f32 to vector<20x128xf32>
    %54 = arith.maximumf %52, %53 : vector<20x128xf32>
    %cst_25 = arith.constant dense<0.000000e+00> : vector<15x128xf32>
    %55 = tpu.matmul %2, %54, %cst_25 {dimension_numbers = #tpu.dot_dimension_numbers<[1], [0], [0], [1], [0, 0, 1, 1], [], []>} : vector<15x20xf32>, vector<20x128xf32>, vector<15x128xf32> -> vector<15x128xf32>
    %56 = vector.broadcast %13 : vector<15x1xf32> to vector<15x128xf32>
    %57 = arith.addf %55, %56 : vector<15x128xf32>
    %cst_26 = arith.constant 0.000000e+00 : f32
    %58 = vector.broadcast %cst_26 : f32 to vector<15x128xf32>
    %59 = arith.cmpf ogt, %57, %58 : vector<15x128xf32>
    %cst_27 = arith.constant 0.00999999977 : f32
    %60 = vector.broadcast %cst_27 : f32 to vector<15x128xf32>
    %61 = arith.mulf %60, %57 : vector<15x128xf32>
    %62 = arith.select %59, %57, %61 : vector<15x128xi1>, vector<15x128xf32>
    %cst_28 = arith.constant dense<0.000000e+00> : vector<2x128xf32>
    %63 = tpu.matmul %3, %62, %cst_28 {dimension_numbers = #tpu.dot_dimension_numbers<[1], [0], [0], [1], [0, 0, 1, 1], [], []>} : vector<2x15xf32>, vector<15x128xf32>, vector<2x128xf32> -> vector<2x128xf32>
    %cst_29 = arith.constant dense<0.000000e+00> : vector<3x128xf32>
    %64 = tpu.matmul %4, %57, %cst_29 {dimension_numbers = #tpu.dot_dimension_numbers<[1], [0], [0], [1], [0, 0, 1, 1], [], []>} : vector<3x15xf32>, vector<15x128xf32>, vector<3x128xf32> -> vector<3x128xf32>
    %65 = vector.broadcast %16 : vector<3x1xf32> to vector<3x128xf32>
    %66 = arith.addf %64, %65 : vector<3x128xf32>
    %67 = vector.extract_strided_slice %63 {offsets = [0, 0], sizes = [1, 128], strides = [1, 1]} : vector<2x128xf32> to vector<1x128xf32>
    %c126_i32 = arith.constant 126 : i32
    %68 = tpu.dynamic_rotate %67 by %c126_i32 dim 1 : vector<1x128xf32>, i32 -> vector<1x128xf32>
    %69 = vector.extract_strided_slice %63 {offsets = [1, 0], sizes = [1, 128], strides = [1, 1]} : vector<2x128xf32> to vector<1x128xf32>
    %70 = arith.addf %68, %69 : vector<1x128xf32>
    %71 = vector.broadcast %15 : vector<1x1xf32> to vector<1x128xf32>
    %72 = arith.addf %70, %71 : vector<1x128xf32>
    %73 = arith.negf %72 : vector<1x128xf32>
    %74 = math.exp %73 : vector<1x128xf32>
    %cst_30 = arith.constant 1.000000e+00 : f32
    %75 = vector.broadcast %cst_30 : f32 to vector<1x128xf32>
    %76 = arith.addf %75, %74 : vector<1x128xf32>
    %77 = arith.divf %75, %76 : vector<1x128xf32>
    %c126_i32_31 = arith.constant 126 : i32
    %78 = tpu.dynamic_rotate %66 by %c126_i32_31 dim 1 : vector<3x128xf32>, i32 -> vector<3x128xf32>
    %79 = vector.broadcast %77 : vector<1x128xf32> to vector<3x128xf32>
    %80 = arith.mulf %79, %78 : vector<3x128xf32>
    %cst_32 = arith.constant 1.000000e+00 : f32
    %81 = vector.broadcast %cst_32 : f32 to vector<1x128xf32>
    %82 = arith.subf %81, %77 : vector<1x128xf32>
    %83 = vector.broadcast %82 : vector<1x128xf32> to vector<3x128xf32>
    %84 = arith.mulf %83, %66 : vector<3x128xf32>
    %85 = arith.addf %80, %84 : vector<3x128xf32>
    %c0_33 = arith.constant 0 : index
    %c0_34 = arith.constant 0 : index
    %86 = vector.load %arg3[%c0_33, %c0_34] : memref<3x128xf32, #tpu.memory_space<vmem>>, vector<3x128xf32>
    tpu.vector_store %arg3[%c0_33, %c0_34], %85 {strides = array<i32>} : memref<3x128xf32, #tpu.memory_space<vmem>>, vector<3x128xf32>,
    return
  }
}

</mosaic_0001>

<bundles_post_ra>
// kernel: gate_promoter_forward.1
= control target key start
LH: loop header
LB: loop body
LE: loop exit
PB: predicated region body
PF: predicated region fallthrough
CT: control target
= control target key end

     0   :  { %v481_v0 = vmov 0   ;;  %vm110_vm2 = vcmask 1046528   ;;  %vm100_vm3 = vcmask 121856   ;;  %vm189_vm4 = vcmask 1043456   ;;  %s483_s11 = smov 126   ;;  %s645_s2 = inlined_call_operand.vmem [shape: f32[232,1], index: 2, kind: input, shape index: {}]   ;;  %s646_s0 = inlined_call_operand.vmem [shape: f32[15,128], index: 0, kind: input, shape index: {}]   ;;  %s647_s1 = inlined_call_operand.vmem [shape: f32[80,32], index: 1, kind: input, shape index: {}]   ;;  %s648_s3 = inlined_call_operand.vmem [shape: f32[3,128], index: 3, kind: output, shape index: {}]  }
   0x1   :  { %475 = vset.pattern.permute.xlu1 %v481_v0  ;;  %474 = vset.pattern.permute.xlu0 %v481_v0  ;;  %v27_v1 = vld [vmem:[%s645_s2 + $0x18] sm:$0x7f]  ;;  %v25_v2 = vld [vmem:[%s645_s2 + $0x8] sm:$0x7f]  ;;  %v26_v3 = vld [vmem:[%s645_s2 + $0x10] sm:$0xff]  ;;  %vm179_vm5 = vcmask 162816  }
   0x2   :  { %78 = vperm.xlu1 %475, %v27_v1   ;;  %66 = vperm.xlu0 %474, %v25_v2   ;;  %v24_v4 = vld [vmem:[%s645_s2] sm:$0xff]  ;;  %v33_v6 = vld [vmem:[%s645_s2 + $0x48] sm:$0xf]  ;;  %v31_v7 = vld [vmem:[%s645_s2 + $0x38] sm:$0xff] }
   0x3   :  { %476 = vset.pattern.permute.xlu2 %v481_v0  ;;  %v28_v5 = vld [vmem:[%s645_s2 + $0x20] sm:$0xff]  ;;  %v39_v9 = vld [vmem:[%s645_s2 + $0x78] sm:$0xf]  ;;  %v34_v10 = vld [vmem:[%s645_s2 + $0x50] sm:$0xff] }
   0x4   :  { %v36_v8 = vld [vmem:[%s645_s2 + $0x60] sm:$0xf]  ;;  %v49_v11 = vld [vmem:[%s645_s2 + $0xc8] sm:$0xff]  ;;  %v38_v12 = vld [vmem:[%s645_s2 + $0x70] sm:$0xff] }
   0x5   :  { %v30_v13 = vld [vmem:[%s645_s2 + $0x30] sm:$0xf]  ;;  %v48_v15 = vld [vmem:[%s645_s2 + $0xc0] sm:$0xff]  ;;  %v29_v16 = vld [vmem:[%s645_s2 + $0x28] sm:$0xff] }
   0x6   :  { %97 = vperm.xlu2 %476, %v30_v13   ;;  %v42_v14 = vld [vmem:[%s645_s2 + $0x90] sm:$0xf]  ;;  %v40_v17 = vld [vmem:[%s645_s2 + $0x80] sm:$0xff]  ;;  %v45_v18 = vld [vmem:[%s645_s2 + $0xa8] sm:$0xf] }
   0x7   :  { %v32_v19 = vld [vmem:[%s645_s2 + $0x40] sm:$0xff]  ;;  %v47_v20 = vld [vmem:[%s645_s2 + $0xb8] sm:$0x7f]  ;;  %v50_v24 = vld [vmem:[%s645_s2 + $0xd0] sm:$0xf] }
   0x8   :  { %v43_v21 = vld [vmem:[%s645_s2 + $0x98] sm:$0xff]  ;;  %v52_v22 = vld [vmem:[%s645_s2 + $0xe0] sm:$0x7]  ;;  %v37_v25 = vld [vmem:[%s645_s2 + $0x68] sm:$0xff] }
   0x9   :  { %v35_v23 = vld [vmem:[%s645_s2 + $0x58] sm:$0xff]  ;;  %v54_v26 = vld [vmem:[%s646_s0 + $0x8] sm:$0x7f]  ;;  %v53_v31 = vld [vmem:[%s646_s0] sm:$0xff] }
   0xa   :  { %73 = vperm.xlu1 %475, %v26_v3   ;;  %61 = vperm.xlu0 %474, %v24_v4   ;;  %v41_v27 = vld [vmem:[%s645_s2 + $0x88] sm:$0xff]  ;;  %vm56_vm0 = vcmp.ne.f32.partialorder %v54_v26, %v54_v26  ;;  %v44_v32 = vld [vmem:[%s645_s2 + $0xa0] sm:$0xff]  ;;  %vm55_vm1 = vcmp.ne.f32.partialorder %v53_v31, %v53_v31  ;;  %v46_v38 = vld [vmem:[%s645_s2 + $0xb0] sm:$0xff] }
   0xb   :  { %v58_v28 = vsel %vm56_vm0, 0.0, %v54_v26  ;;  %v57_v36 = vsel %vm55_vm1, 0.0, %v53_v31  ;;  %v14_v43 = vld [vmem:[%s647_s1] sm:$0xff]  ;;  %v51_v44 = vld [vmem:[%s645_s2 + $0xd8] sm:$0x1]  ;;  %v15_v45 = vld [vmem:[%s647_s1 + $0x8] sm:$0xff] }
   0xc   :  { %v16_v46 = vld [vmem:[%s647_s1 + $0x10] sm:$0xf] }
   0xe   :  { %92 = vperm.xlu2 %476, %v29_v16  }
  0x12   :  { %87 = vperm.xlu1 %475, %v28_v5   ;;  %152 = vperm.xlu0 %474, %v33_v6  }
  0x16   :  { %147 = vperm.xlu2 %476, %v32_v19  }
  0x1a   :  { %142 = vperm.xlu1 %475, %v31_v7   ;;  %170 = vperm.xlu0 %474, %v36_v8   ;;  %v17_v7 = vld [vmem:[%s647_s1 + $0x18] sm:$0xff]  ;;  %v18_v8 = vld [vmem:[%s647_s1 + $0x20] sm:$0xff] }
  0x1e   :  { %165 = vperm.xlu2 %476, %v35_v23  }
  0x22   :  { %234 = vperm.xlu1 %475, %v39_v9   ;;  %160 = vperm.xlu0 %474, %v34_v10   ;;  %v19_v9 = vld [vmem:[%s647_s1 + $0x28] sm:$0xf] }
  0x26   :  { %257 = vperm.xlu2 %476, %v50_v24  }
  0x2a   :  { %252 = vperm.xlu1 %475, %v49_v11   ;;  %229 = vperm.xlu0 %474, %v38_v12  }
  0x2e   :  { %224 = vperm.xlu2 %476, %v37_v25  }
  0x32   :  { %278 = vperm.xlu1 %475, %v42_v14   ;;  %247 = vperm.xlu0 %474, %v48_v15   ;;  %v240_v14 = vlaneseq }
  0x36   :  { %273 = vperm.xlu2 %476, %v41_v27  }
  0x3a   :  { %268 = vperm.xlu1 %475, %v40_v17   ;;  %296 = vperm.xlu0 %474, %v45_v18   ;;  %v241_v17 = vand.u32 127, %v240_v14 }
  0x3c   :  { %vm242_vm6 = vcmp.lt.s32.totalorder %v241_v17, 2 }
  0x3e   :  { %291 = vperm.xlu2 %476, %v44_v32  }
  0x42   :  { %312 = vperm.xlu1 %475, %v47_v20   ;;  %286 = vperm.xlu0 %474, %v43_v21  }
  0x46   :  { %307 = vperm.xlu2 %476, %v46_v38  }
  0x4a   :  { %381 = vperm.xlu0 %474, %v52_v22   ;;  %v482_v22 = vmov 0.0  }
  0x4b   :  { %v462_v23 = vsel %vm242_vm6, 1.0, %v482_v22 }
  0x4e   :  { %418 = vperm.xlu2 %476, %v51_v44  }
  0x60   :  { %v98_v47 = vpop.permute.xlu2 %97 }
  0x68   :  { %v93_v48 = vpop.permute.xlu2 %92 }
  0x70   :  { %v148_v53 = vpop.permute.xlu2 %147 }
  0x74   :  { %v79_v29 = vpop.permute.xlu1 %78  ;;  %v67_v30 = vpop.permute.xlu0 %66 }
  0x75   :  { %v70_v33 = vmul.f32 %v67_v30, %v58_v28 }
  0x77   :  { %v82_v34 = vadd.f32 %v79_v29, %v70_v33 }
  0x78   :  { %v166_v63 = vpop.permute.xlu2 %165 }
  0x79   :  { %v84_v35 = vmax.f32 %v82_v34, 0.0 }
  0x7b   :  { %454 = vmatpush.msk.msra.mxu0 %vm110_vm2, %v84_v35 }
  0x7c   :  { %v62_v37 = vpop.permute.xlu0 %61  ;;  %v74_v40 = vpop.permute.xlu1 %73 }
  0x7d   :  { %v69_v39 = vmul.f32 %v62_v37, %v57_v36 }
  0x7f   :  { %v81_v41 = vadd.f32 %v74_v40, %v69_v39 }
  0x80   :  { %v258_v11 = vpop.permute.xlu2 %257 }
  0x81   :  { %v83_v42 = vmax.f32 %v81_v41, 0.0  ;;  %v262_v34 = vmul.f32 %v462_v23, %v258_v11 }
  0x83   :  { %129 = vmatpush.msra.mxu0 %v83_v42 }
  0x84   :  { %455 = vmatmul.msk.f32.vlgmr.msra.gmra.mxu0 %vm100_vm3, %v14_v43  ;;  %v153_v50 = vpop.permute.xlu0 %152  ;;  %v88_v51 = vpop.permute.xlu1 %87 }
  0x88   :  { %v225_v16 = vpop.permute.xlu2 %224 }
  0x8c   :  { %456 = vmatmul.msk.f32.gmra.mxu0 %vm100_vm3, %v15_v45  ;;  %v171_v54 = vpop.permute.xlu0 %170  ;;  %v143_v60 = vpop.permute.xlu1 %142 }
  0x90   :  { %v274_v26 = vpop.permute.xlu2 %273 }
  0x94   :  { %457 = vmatmul.msk.f32.gmra.mxu0 %vm100_vm3, %v16_v46  ;;  %v161_v2 = vpop.permute.xlu0 %160  ;;  %v235_v10 = vpop.permute.xlu1 %234 }
  0x98   :  { %v292_v42 = vpop.permute.xlu2 %291 }
  0x9c   :  { %v230_v12 = vpop.permute.xlu0 %229  ;;  %v253_v15 = vpop.permute.xlu1 %252 }
  0x9d   :  { %v261_v27 = vmul.f32 %v462_v23, %v253_v15 }
  0xa4   :  { %v248_v18 = vpop.permute.xlu0 %247  ;;  %v279_v24 = vpop.permute.xlu1 %278 }
  0xa5   :  { %v260_v31 = vmul.f32 %v462_v23, %v248_v18 }
  0xac   :  { %v297_v29 = vpop.permute.xlu0 %296  ;;  %v269_v39 = vpop.permute.xlu1 %268 }
  0xb4   :  { %v287_v45 = vpop.permute.xlu0 %286 }
 0x101   :  { %v131_v49 = vpop.f32.mrf.mxu0 }
 0x102   :  { %v132_v56 = vadd.f32 %v131_v49, %v88_v51  ;;  %v21_v51 = vld [vmem:[%s647_s1 + $0x38] sm:$0x7f] }
 0x104   :  { %v155_v61 = vmul.f32 %v143_v60, %v132_v56 }
 0x106   :  { %v173_v4 = vadd.f32 %v161_v2, %v155_v61  ;;  %v22_v61 = vld [vmem:[%s647_s1 + $0x40] sm:$0x3] }
 0x108   :  { %v176_v6 = vmax.f32 %v173_v4, 0.0 }
 0x109   :  { %v134_v52 = vpop.f32.mrf.mxu0 }
 0x10a   :  { %v135_v55 = vadd.f32 %v134_v52, %v93_v48 }
 0x10c   :  { %v156_v58 = vmul.f32 %v148_v53, %v135_v55  ;;  %v308_v53 = vpop.permute.xlu2 %307 }
 0x10e   :  { %v174_v1 = vadd.f32 %v166_v63, %v156_v58  ;;  %v23_v63 = vld [vmem:[%s647_s1 + $0x48] sm:$0x7] }
 0x110   :  { %v177_v5 = vmax.f32 %v174_v1, 0.0  ;;  %v382_v1 = vpop.permute.xlu0 %381 }
 0x111   :  { %v137_v57 = vpop.f32.mrf.mxu0 }
 0x112   :  { %v138_v59 = vadd.f32 %v137_v57, %v98_v47 }
 0x114   :  { %v157_v62 = vmul.f32 %v153_v50, %v138_v59  ;;  %v20_v50 = vld [vmem:[%s647_s1 + $0x30] sm:$0xff] }
 0x116   :  { %v175_v0 = vadd.f32 %v171_v54, %v157_v62 }
 0x118   :  { %v178_v3 = vmax.f32 %v175_v0, 0.0 }
 0x11a   :  { %458 = vmatpush.msk.msra.mxu1 %vm189_vm4, %v178_v3 }
 0x11c   :  { %207 = vmatpush.msra.mxu1 %v177_v5 }
 0x11e   :  { %208 = vmatpush.msra.mxu1 %v176_v6 }
 0x11f   :  { %459 = vmatmul.msk.f32.vlgmr.msra.gmra.mxu1 %vm179_vm5, %v17_v7  ;;  %v419_v7 = vpop.permute.xlu2 %418 }
 0x127   :  { %460 = vmatmul.msk.f32.gmra.mxu1 %vm179_vm5, %v18_v8 }
 0x12f   :  { %461 = vmatmul.msk.f32.gmra.mxu1 %vm179_vm5, %v19_v9 }
 0x19c   :  { %v210_v13 = vpop.f32.mrf.mxu1 }
 0x19d   :  { %v219_v21 = vadd.f32 %v210_v13, %v132_v56 }
 0x19f   :  { %v237_v28 = vadd.f32 %v225_v16, %v219_v21 }
 0x1a1   :  { %v263_v35 = vadd.f32 %v260_v31, %v237_v28 }
 0x1a3   :  { %v281_v41 = vmul.f32 %v269_v39, %v263_v35 }
 0x1a4   :  { %v213_v19 = vpop.f32.mrf.mxu1 }
 0x1a5   :  { %v220_v20 = vadd.f32 %v213_v19, %v135_v55  ;;  %v299_v47 = vadd.f32 %v287_v45, %v281_v41  ;;  %v313_v55 = vpop.permute.xlu1 %312 }
 0x1a7   :  { %v238_v25 = vadd.f32 %v230_v12, %v220_v20  ;;  %v302_v49 = vmax.f32 %v299_v47, 0.0 }
 0x1a9   :  { %v264_v32 = vadd.f32 %v261_v27, %v238_v25 }
 0x1ab   :  { %v282_v38 = vmul.f32 %v274_v26, %v264_v32 }
 0x1ac   :  { %v216_v30 = vpop.f32.mrf.mxu1 }
 0x1ad   :  { %v221_v33 = vadd.f32 %v216_v30, %v138_v59  ;;  %v300_v44 = vadd.f32 %v292_v42, %v282_v38 }
 0x1af   :  { %v239_v36 = vadd.f32 %v235_v10, %v221_v33  ;;  %v303_v48 = vmax.f32 %v300_v44, 0.0 }
 0x1b1   :  { %v265_v37 = vadd.f32 %v262_v34, %v239_v36 }
 0x1b3   :  { %v283_v40 = vmul.f32 %v279_v24, %v265_v37 }
 0x1b5   :  { %v301_v43 = vadd.f32 %v297_v29, %v283_v40 }
 0x1b7   :  { %v304_v46 = vmax.f32 %v301_v43, 0.0 }
 0x1b9   :  { %463 = vmatpush.msk.msra.mxu2 %vm189_vm4, %v304_v46 }
 0x1bb   :  { %338 = vmatpush.msra.mxu2 %v303_v48 }
 0x1bd   :  { %339 = vmatpush.msra.mxu2 %v302_v49 }
 0x1be   :  { %464 = vmatmul.msk.f32.vlgmr.msra.gmra.mxu2 %vm179_vm5, %v20_v50 }
 0x1c6   :  { %465 = vmatmul.msk.f32.gmra.mxu2 %vm179_vm5, %v21_v51 }
 0x241   :  { %v341_v52 = vpop.f32.mrf.mxu2 }
 0x242   :  { %v342_v54 = vadd.f32 %v341_v52, %v308_v53 }
 0x244   :  { %v349_v59 = vmul.f32 0.01, %v342_v54  ;;  %vm347_vm8 = vcmp.gt.f32.partialorder %v342_v54, 0.0 }
 0x246   :  { %v351_v62 = vsel %vm347_vm8, %v342_v54, %v349_v59 }
 0x249   :  { %v344_v56 = vpop.f32.mrf.mxu2 }
 0x24a   :  { %v345_v57 = vadd.f32 %v344_v56, %v313_v55 }
 0x24c   :  { %vm348_vm7 = vcmp.gt.f32.partialorder %v345_v57, 0.0  ;;  %v350_v58 = vmul.f32 0.01, %v345_v57 }
 0x24e   :  { %v352_v60 = vsel %vm348_vm7, %v345_v57, %v350_v58 }
 0x24f   :  { %466 = vmatpush.msk.msra.mxu3 %vm110_vm2, %v352_v60 }
 0x251   :  { %374 = vmatpush.msra.mxu3 %v351_v62 }
 0x252   :  { %467 = vmatmul.msk.f32.vlgmr.msra.gmra.mxu3 %vm100_vm3, %v22_v61 }
 0x253   :  { %468 = vmatpush.msk.msrb.mxu3 %vm110_vm2, %v345_v57 }
 0x255   :  { %405 = vmatpush.msrb.mxu3 %v342_v54 }
 0x25a   :  { %469 = vmatmul.msk.f32.vlgmr.msrb.gmra.mxu3 %vm100_vm3, %v23_v63 }
 0x2d5   :  { %v376_v0 = vpop.f32.mrf.mxu3 }
 0x2d6   :  { %410 = vrot.lane.b32.xlu1 %v376_v0, %s483_s11  ;;  %v413_v4 = vrot.slane %v376_v0, 1 }
 0x2dd   :  { %v407_v2 = vpop.f32.mrf.mxu3 }
 0x2de   :  { %v408_v3 = vadd.f32 %v407_v2, %v382_v1 }
 0x2e0   :  { %441 = vrot.lane.b32.xlu0 %v408_v3, %s483_s11 }
 0x348   :  { %v411_v5 = vpop.permute.xlu1 %410 }
 0x349   :  { %v415_v6 = vadd.f32 %v413_v4, %v411_v5 }
 0x34b   :  { %v421_v8 = vadd.f32 %v419_v7, %v415_v6 }
 0x34d   :  { %v470_v9 = vmul.f32 -1.442695, %v421_v8 }
 0x34f   :  { %477 = vpow2.f32 %v470_v9 }
 0x352   :  { %v442_v25 = vpop.permute.xlu0 %441 }
 0x355   :  { %v478_v10 = vpop.eup %477 }
 0x356   :  { %v425_v11 = vadd.f32 1.0, %v478_v10 }
 0x358   :  { %479 = vrcp.f32 %v425_v11  ;;  %v437_v15 = vand.u32 2147483648, %v425_v11  ;;  %v435_v17 = vand.u32 2147483647, %v425_v11  ;;  %vm431_vm10 = vweird.f32 %v425_v11 }
 0x35a   :  { %v438_v19 = vor.u32 1.1754944e-38, %v437_v15  ;;  %vm436_vm12 = vcmp.eq.f32.partialorder %v435_v17, 8.507059e+37 }
 0x35e   :  { %v480_v12 = vpop.eup %479 }
 0x35f   :  { %v427_v13 = vmul.f32 %v480_v12, %v425_v11  ;;  %vm432_vm9 = vweird.f32 %v480_v12 }
 0x360   :  { %vm433_vm11 = vmor %vm431_vm10, %vm432_vm9 }
 0x361   :  { %v428_v14 = vsub.f32 1.0, %v427_v13 }
 0x363   :  { %v429_v16 = vmul.f32 %v480_v12, %v428_v14 }
 0x365   :  { %v430_v18 = vadd.f32 %v480_v12, %v429_v16 }
 0x367   :  { %v434_v20 = vsel %vm433_vm11, %v480_v12, %v430_v18 }
 0x368   :  { %v439_v21 = vsel %vm436_vm12, %v438_v19, %v434_v20 }
 0x369   :  { %v443_v22 = vperm.slane %v439_v21, 0  ;;  %v445_v23 = vsub.f32 1.0, %v439_v21 }
 0x36b   :  { %v446_v24 = vperm.slane %v445_v23, 0  ;;  %v444_v26 = vmul.f32 %v443_v22, %v442_v25 }
 0x36d   :  { %v447_v27 = vmul.f32 %v446_v24, %v408_v3 }
 0x36f   :  { %v448_v28 = vadd.f32 %v447_v27, %v444_v26 }
 0x371   :  { %449 = vst [vmem:[%s648_s3] sm:$0x7] %v448_v28 }

</bundles_post_ra>
